<compile_context>
chip_gen: v7x
topology: tpu7x:2x2x1
jax: 0.10.0
libtpu: 0.0.40
codegen_flags: <defaults>
</compile_context>

<pallas_src>
import functools
from typing import NamedTuple, Optional

import jax
import jax.numpy as jnp
import numpy as np
from jax.experimental import pallas as pl
from jax.experimental.pallas import tpu as pltpu

_LANE = 128
_W_PANEL_VMEM_BUDGET = 8 * 1024 * 1024    # double-buffered resident weight panel
_XO_PANEL_VMEM_BUDGET = 16 * 1024 * 1024  # double-buffered x/out streams + tanh cache


def _round_up(x, m):
    return ((x + m - 1) // m) * m


class _Plan(NamedTuple):
    tn: int
    d_out_p: int
    tk: Optional[int]   # None => single full-D_in panel (no reduction grid axis)
    d_in_p: int


def _plan(d_in, d_out, compute_dtype):
    """Shared tiling plan for prepare_weight() and the forward wrapper."""
    c_bytes = jnp.dtype(compute_dtype).itemsize
    d_out_128 = _round_up(d_out, _LANE)            # lane-dense output stores
    tn = d_out_128 if d_out_128 <= 2048 else 1024
    d_out_p = _round_up(d_out_128, tn)
    # Full-D_in weight panel if its (double-buffer-allocated) footprint is modest.
    if 2 * d_in * tn * c_bytes <= _W_PANEL_VMEM_BUDGET:
        return _Plan(tn=tn, d_out_p=d_out_p, tk=None, d_in_p=d_in)
    tk = 512
    return _Plan(tn=tn, d_out_p=d_out_p, tk=tk, d_in_p=_round_up(d_in, tk))


def _default_tanh_dtype(x_dtype):
    """bf16 tanh only when the input is bf16 and the chip has a bf16 EUP (v6e/v7x)."""
    if jnp.dtype(x_dtype) != jnp.dtype(jnp.bfloat16):
        return jnp.float32
    try:
        kind = jax.devices()[0].device_kind.lower()
    except Exception:
        return jnp.float32
    if any(tag in kind for tag in ("v2", "v3", "v4", "v5")):
        return jnp.float32
    return jnp.bfloat16


def _vmem_limit(footprint_bytes):
    # Explicit scoped-VMEM request: safe on v5e (128 MiB phys, 16 MiB default) and
    # capped well below v7x's 64 MiB physical per-core budget.
    return int(min(48 << 20, max(32 << 20, footprint_bytes + (8 << 20))))


def prepare_weight(weight, compute_dtype=jnp.bfloat16):
    """One-time parameter prep: transpose the PyTorch Linear weight [D_out, D_in] to
    W_T = [D_in(_p), D_out_p], zero-pad D_out to a lane-dense multiple (and D_in only
    in the rare k-tiled fallback), and cast to the MXU-native dtype."""
    d_out, d_in = weight.shape
    plan = _plan(d_in, d_out, compute_dtype)
    w_t = jnp.zeros((plan.d_in_p, plan.d_out_p), dtype=compute_dtype)
    w_t = w_t.at[:d_in, :d_out].set(weight.T.astype(compute_dtype))
    return w_t


# ---------------------------------------------------------------------------
# Kernels
# ---------------------------------------------------------------------------

def _fc_cls_fullk_kernel(x_ref, wt_ref, o_ref, a_ref, *, tanh_dtype):
    # x_ref : [tm, D_in]   input row panel (block index independent of j -> DMA'd once per i)
    # wt_ref: [D_in, tn]   pre-transposed weight panel (index (0, j): resident when n_j == 1)
    # o_ref : [tm, tn]     output tile (lane-dense, padded D_out)
    # a_ref : [tm, D_in]   VMEM cache of tanh(dropout(x)) so tanh/casts run once per batch tile
    @pl.when(pl.program_id(1) == 0)
    def _():
        a_ref[...] = jnp.tanh(x_ref[...].astype(tanh_dtype)).astype(a_ref.dtype)

    o_ref[...] = jnp.dot(
        a_ref[...], wt_ref[...], preferred_element_type=jnp.float32
    ).astype(o_ref.dtype)


def _fc_cls_ktiled_kernel(x_ref, wt_ref, o_ref, acc_ref, *, tanh_dtype):
    # Fallback for very large D_in panels: classic (i, j, k) tiling with f32 accumulator.
    @pl.when(pl.program_id(2) == 0)
    def _():
        acc_ref[...] = jnp.zeros_like(acc_ref)

    a = jnp.tanh(x_ref[...].astype(tanh_dtype)).astype(wt_ref.dtype)
    acc_ref[...] += jnp.dot(a, wt_ref[...], preferred_element_type=jnp.float32)

    @pl.when(pl.program_id(2) == pl.num_programs(2) - 1)
    def _():
        o_ref[...] = acc_ref[...].astype(o_ref.dtype)


# ---------------------------------------------------------------------------
# Forward wrapper
# ---------------------------------------------------------------------------

def fully_connected_cls_forward(x, w_t, d_out, *, tanh_dtype=None):
    """x: [..., D_in]; w_t: output of prepare_weight(); d_out: true output dim."""
    d_in = x.shape[-1]
    lead_shape = x.shape[:-1]
    x = x.reshape(-1, d_in)
    b = x.shape[0]

    compute_dtype = w_t.dtype
    plan = _plan(d_in, d_out, compute_dtype)
    assert w_t.shape == (plan.d_in_p, plan.d_out_p), \
        "weight was prepared for different dims/dtype"
    if tanh_dtype is None:
        tanh_dtype = _default_tanh_dtype(x.dtype)

    x_bytes = jnp.dtype(x.dtype).itemsize
    c_bytes = jnp.dtype(compute_dtype).itemsize
    o_bytes = x_bytes
    gran = 16 if x_bytes == 2 else 8  # bf16 sublane pairs pack densely at 16 rows
    tn, d_out_p = plan.tn, plan.d_out_p
    n_j = d_out_p // tn

    if plan.tk is None:
        # ---- Common path: single full-D_in panel, grid (n_i, n_j), no accumulator ----
        d_in_blk = d_in
        per_row = 2 * d_in_blk * x_bytes + 2 * tn * o_bytes + d_in_blk * c_bytes
        tm = min(512, _XO_PANEL_VMEM_BUDGET // per_row)
        tm = max(gran, (tm // gran) * gran)
        tm = min(tm, _round_up(b, gran))
        if n_j == 1 and b > gran:
            # Megacore: make sure the (only) parallel axis has >= 2 tiles.
            tm = min(tm, _round_up((b + 1) // 2, gran))
        n_i = pl.cdiv(b, tm)

        footprint = (2 * tm * d_in_blk * x_bytes      # x double buffer
                     + 2 * d_in_blk * tn * c_bytes    # weight double buffer
                     + 2 * tm * tn * o_bytes          # out double buffer
                     + tm * d_in_blk * c_bytes)       # tanh cache scratch

        kernel = functools.partial(_fc_cls_fullk_kernel, tanh_dtype=tanh_dtype)
        out_p = pl.pallas_call(
            kernel,
            out_shape=jax.ShapeDtypeStruct((b, d_out_p), x.dtype),
            grid_spec=pltpu.PrefetchScalarGridSpec(
                num_scalar_prefetch=0,
                grid=(n_i, n_j),
                in_specs=[
                    pl.BlockSpec((tm, d_in_blk), lambda i, j: (i, 0)),   # x read once
                    pl.BlockSpec((d_in_blk, tn), lambda i, j: (0, j)),   # W resident
                ],
                out_specs=pl.BlockSpec((tm, tn), lambda i, j: (i, j)),
                scratch_shapes=[pltpu.VMEM((tm, d_in_blk), compute_dtype)],
            ),
            compiler_params=pltpu.CompilerParams(
                dimension_semantics=("parallel", "parallel"),
                vmem_limit_bytes=_vmem_limit(footprint),
            ),
            cost_estimate=pl.CostEstimate(
                flops=2 * b * d_in * d_out_p,
                transcendentals=b * d_in,
                bytes_accessed=(b * d_in * x_bytes
                                + d_in * d_out_p * c_bytes * (1 if n_j == 1 else n_i)
                                + b * d_out_p * o_bytes),
            ),
        )(x, w_t)
    else:
        # ---- Fallback: D_in panel too big for VMEM -> k-tiled accumulate ----
        tk, d_in_p = plan.tk, plan.d_in_p
        if d_in_p != d_in:
            # Zero K-padding is exact: tanh(0)=0 and padded weight rows are zero.
            x = jnp.pad(x, ((0, 0), (0, d_in_p - d_in)))
        per_row = 2 * tk * x_bytes + 2 * tn * o_bytes + 4 * tn
        tm = min(512, _XO_PANEL_VMEM_BUDGET // per_row)
        tm = max(gran, (tm // gran) * gran)
        tm = min(tm, _round_up(b, gran))
        if n_j == 1 and b > gran:
            tm = min(tm, _round_up((b + 1) // 2, gran))
        n_i = pl.cdiv(b, tm)
        n_k = d_in_p // tk

        footprint = (2 * tm * tk * x_bytes + 2 * tk * tn * c_bytes
                     + 2 * tm * tn * o_bytes + 4 * tm * tn)

        kernel = functools.partial(_fc_cls_ktiled_kernel, tanh_dtype=tanh_dtype)
        out_p = pl.pallas_call(
            kernel,
            out_shape=jax.ShapeDtypeStruct((b, d_out_p), x.dtype),
            grid_spec=pltpu.PrefetchScalarGridSpec(
                num_scalar_prefetch=0,
                grid=(n_i, n_j, n_k),
                in_specs=[
                    pl.BlockSpec((tm, tk), lambda i, j, k: (i, k)),
                    pl.BlockSpec((tk, tn), lambda i, j, k: (k, j)),
                ],
                out_specs=pl.BlockSpec((tm, tn), lambda i, j, k: (i, j)),
                scratch_shapes=[pltpu.VMEM((tm, tn), jnp.float32)],
            ),
            compiler_params=pltpu.CompilerParams(
                dimension_semantics=("parallel", "parallel", "arbitrary"),
                vmem_limit_bytes=_vmem_limit(footprint),
            ),
            cost_estimate=pl.CostEstimate(
                flops=2 * b * d_in_p * d_out_p,
                transcendentals=b * d_in_p * n_j,
                bytes_accessed=(b * d_in_p * x_bytes * n_j
                                + d_in_p * d_out_p * c_bytes * n_i
                                + b * d_out_p * o_bytes),
            ),
        )(x, w_t)

    out = out_p[:, :d_out]
    return out.reshape(lead_shape + (d_out,))


def xavier_uniform(key, shape, dtype=jnp.float32):
    # PyTorch nn.init.xavier_uniform_: bound = sqrt(6 / (fan_in + fan_out))
    fan_out, fan_in = shape  # Linear weight is [out, in]
    bound = float(np.sqrt(6.0 / (fan_in + fan_out)))
    return jax.random.uniform(key, shape, dtype=dtype, minval=-bound, maxval=bound)


if __name__ == "__main__":
    key = jax.random.PRNGKey(0)
    k_x, k_w = jax.random.split(key)

    # Small demo shapes consistent with the module (a CLS head on a pooled feature).
    B, D_in, D_out = 8, 32, 16
    x = jax.random.normal(k_x, (B, D_in), dtype=jnp.float32)
    weight = xavier_uniform(k_w, (D_out, D_in))  # [D_out, D_in], PyTorch convention

    # One-time weight prep (transpose + pad + cast to MXU-native bf16).
    w_t = prepare_weight(weight)

    out = fully_connected_cls_forward(x, w_t, D_out)
    out = jax.block_until_ready(out)

    # Sanity check vs plain-JAX f32 reference (eval-mode dropout = identity).
    # Tolerance loosened because the MXU operands are intentionally bf16.
    ref = jnp.tanh(x) @ weight.T
    np.testing.assert_allclose(np.asarray(out), np.asarray(ref), rtol=5e-2, atol=5e-2)

    print("KERNEL_OK")
</pallas_src>

<mosaic_0001>
module attributes {stable_mosaic.version = 11 : i64} {
  func.func @_fc_cls_fullk_kernel(%arg0: i32, %arg1: i32, %arg2: memref<8x32xf32, #tpu.memory_space<vmem>>, %arg3: memref<32x128xbf16, #tpu.memory_space<vmem>>, %arg4: memref<8x128xf32, #tpu.memory_space<vmem>>, %arg5: memref<8x32xbf16, #tpu.memory_space<vmem>>) attributes {dimension_semantics = [#tpu.dimension_semantics<parallel>, #tpu.dimension_semantics<parallel>], iteration_bounds = array<i64: 1, 1>, scalar_prefetch = 0 : i64, scratch_operands = 1 : i64, tpu.core_type = #tpu.core_type<tc>, window_params = [{transform_indices = @transform_0, window_bounds = array<i64: 8, 32>}, {transform_indices = @transform_1, window_bounds = array<i64: 32, 128>}, {transform_indices = @transform_2, window_bounds = array<i64: 8, 128>}]} {
    %c0_i32 = arith.constant 0 : i32
    %0 = arith.cmpi eq, %arg1, %c0_i32 : i32
    %1 = arith.extui %0 : i1 to i32
    %c0_i32_0 = arith.constant 0 : i32
    %2 = arith.cmpi ne, %1, %c0_i32_0 : i32
    scf.if %2 {
      %c0_6 = arith.constant 0 : index
      %c0_7 = arith.constant 0 : index
      %7 = vector.load %arg2[%c0_6, %c0_7] : memref<8x32xf32, #tpu.memory_space<vmem>>, vector<8x32xf32>
      %8 = math.tanh %7 : vector<8x32xf32>
      %9 = arith.truncf %8 : vector<8x32xf32> to vector<8x32xbf16>
      %c0_8 = arith.constant 0 : index
      %c0_9 = arith.constant 0 : index
      %10 = vector.load %arg5[%c0_8, %c0_9] : memref<8x32xbf16, #tpu.memory_space<vmem>>, vector<8x32xbf16>
      tpu.vector_store %arg5[%c0_8, %c0_9], %9 {strides = array<i32>} : memref<8x32xbf16, #tpu.memory_space<vmem>>, vector<8x32xbf16>,
    } else {
    }
    %c0 = arith.constant 0 : index
    %c0_1 = arith.constant 0 : index
    %3 = vector.load %arg5[%c0, %c0_1] : memref<8x32xbf16, #tpu.memory_space<vmem>>, vector<8x32xbf16>
    %c0_2 = arith.constant 0 : index
    %c0_3 = arith.constant 0 : index
    %4 = vector.load %arg3[%c0_2, %c0_3] : memref<32x128xbf16, #tpu.memory_space<vmem>>, vector<32x128xbf16>
    %cst = arith.constant dense<0.000000e+00> : vector<8x128xf32>
    %5 = tpu.matmul %3, %4, %cst {dimension_numbers = #tpu.dot_dimension_numbers<[1], [0], [0], [1], [0, 0, 1, 1], [], []>} : vector<8x32xbf16>, vector<32x128xbf16>, vector<8x128xf32> -> vector<8x128xf32>
    %c0_4 = arith.constant 0 : index
    %c0_5 = arith.constant 0 : index
    %6 = vector.load %arg4[%c0_4, %c0_5] : memref<8x128xf32, #tpu.memory_space<vmem>>, vector<8x128xf32>
    tpu.vector_store %arg4[%c0_4, %c0_5], %5 {strides = array<i32>} : memref<8x128xf32, #tpu.memory_space<vmem>>, vector<8x128xf32>,
    return
  }
  func.func @transform_0(%arg0: i32, %arg1: i32) -> (i32, i32) {
    %c0_i32 = arith.constant 0 : i32
    %c0_i32_0 = arith.constant 0 : i32
    return %arg0, %c0_i32 : i32, i32
  }
  func.func @transform_1(%arg0: i32, %arg1: i32) -> (i32, i32) {
    %c0_i32 = arith.constant 0 : i32
    %c0_i32_0 = arith.constant 0 : i32
    return %c0_i32, %arg1 : i32, i32
  }
  func.func @transform_2(%arg0: i32, %arg1: i32) -> (i32, i32) {
    %c0_i32 = arith.constant 0 : i32
    return %arg0, %arg1 : i32, i32
  }
}

</mosaic_0001>

<bundles_post_ra>
// kernel: tpu_custom_call.1
= control target key start
LH: loop header
LB: loop body
LE: loop exit
PB: predicated region body
PF: predicated region fallthrough
CT: control target
= control target key end

     0   :  { %7 = vsyncpa [#allocation4], 0  ;;  %s288_s0 = inlined_call_operand.hbm [shape: f32[8,32], index: 0, kind: input, shape index: {}]   ;;  %s289_s1 = inlined_call_operand.hbm [shape: bf16[32,128], index: 1, kind: input, shape index: {}]   ;;  %s290_s2 = inlined_call_operand.hbm [shape: f32[8,128], index: 2, kind: output, shape index: {}]  }
   0x1   :  { %8 = vsyncpa [#allocation7], 0 }
   0x2   :  { %9 = vsyncpa [#allocation5], 0  ;;  %s223_s9 = smov [#allocation3]   ;;  %s224_s11 = smov [#allocation6]  }
   0x3   :  { %s16_s10 = sshll.u32 %s223_s9, 4  ;;  %s25_s12 = sshll.u32 %s224_s11, 4  ;;  %s17_s10 = int_to_ptr.vmem [resolvable:$true] %s16_s10  ;;  %s245_s12 = int_to_ptr.vmem [resolvable:$true] %s25_s12 }
   0x4   :  { %s151_s15 = scalar_lea.hbm %s288_s0, 128 }
   0x5   :  { %p152_p0 = scmp.ne.s32.totalorder %s288_s0, %s151_s15  ;;  %p155_p1 = scmp.lt.u32.totalorder %s151_s15, %s288_s0 }
   0x7   :  { %p157_p2 = pnand %p155_p1, %p152_p0 }
   0x9   :  { %160 = shalt.err (!%p157_p2)
}
   0xa   :  { %s161_s20 = scalar_lea.vmem %s17_s10, 128  ;;  %p166_p4 = scmp.lt.s32.totalorder %s17_s10, %s17_s10 }
   0xb   :  { %p162_p3 = scmp.ne.s32.totalorder %s17_s10, %s161_s20  ;;  %p167_p5 = scmp.lt.s32.totalorder %s161_s20, %s161_s20 }
   0xd   :  { %p168_p6 = por %p167_p5, %p166_p4 }
   0xf   :  { %p169_p7 = pnand %p168_p6, %p162_p3 }
  0x11   :  { %172 = shalt.err (!%p169_p7)
}
  0x12   :  { %19 = dma.hbm_to_vmem [thread:$0]  %s288_s0, 128, %s17_s10, [#allocation4]  }
  0x13   :  { %s173_s25 = scalar_lea.hbm %s289_s1, 256 }
  0x14   :  { %p174_p8 = scmp.ne.s32.totalorder %s289_s1, %s173_s25  ;;  %p177_p9 = scmp.lt.u32.totalorder %s173_s25, %s289_s1 }
  0x16   :  { %p179_p10 = pnand %p177_p9, %p174_p8 }
  0x18   :  { %182 = shalt.err (!%p179_p10)
}
  0x19   :  { %s183_s30 = scalar_lea.vmem %s245_s12, 256  ;;  %p188_p12 = scmp.lt.s32.totalorder %s245_s12, %s245_s12 }
  0x1a   :  { %p184_p11 = scmp.ne.s32.totalorder %s245_s12, %s183_s30  ;;  %p189_p13 = scmp.lt.s32.totalorder %s183_s30, %s183_s30 }
  0x1c   :  { %p190_p0 = por %p189_p13, %p188_p12 }
  0x1e   :  { %p191_p1 = pnand %p190_p0, %p184_p11 }
  0x20   :  { %194 = shalt.err (!%p191_p1)
}
  0x21   :  { %s225_s0 = smov 64   ;;  %s226_s3 = smov 4  }
  0x22   :  { %31 = dma.hbm_to_vmem [thread:$0]  %s289_s1, 256, %s245_s12, [#allocation7], %s225_s0, %s225_s0, %s226_s3  }
  0x23   :  { %217 = dma.done.wait [#allocation4], 128  }
  0x24   :  { %218 = vsyncadd [#allocation4], 4294967168 }
  0x25   :  { %219 = dma.done.wait [#allocation7], 256  }
  0x26   :  { %220 = vsyncadd [#allocation7], 4294967040  ;;  %v227_v0 = vmov 0.0   ;;  %vm228_vm0 = vmmov 0   ;;  %v43_v1 = vld [vmem:[#allocation3] sm:$0xff]  ;;  %v147_v2 = vld [vmem:[#allocation6] sm:$0xff]  }
  0x27   :  { %132 = vmatprep.subr.bf16.mxu0 %v227_v0  ;;  %136 = vmatprep.mubr.msk.bf16.mxu0 %vm228_vm0, %v227_v0  ;;  %149 = vtanh.f32 %v43_v1  ;;  %v148_v3 = vld [vmem:[#allocation6 + $0x8] sm:$0xff]   ;;  %vm46_vm1 = vcmask 257024   ;;  %vm65_vm2 = vcmask 261120   ;;  %s229_s1 = smov [#allocation8]  }
  0x28   :  { %133 = vmatpush3.bf16.msra.mxu0 %v147_v2  ;;  %s116_s6 = sshll.u32 %s229_s1, 4  ;;  %s117_s6 = int_to_ptr.vmem [resolvable:$true] %s116_s6 }
  0x29   :  { %134 = vmatprep.subr.bf16.mxu0 %v227_v0  ;;  %s195_s7 = scalar_lea.vmem %s117_s6, 128  ;;  %p200_p3 = scmp.lt.s32.totalorder %s117_s6, %s117_s6 }
  0x2a   :  { %p196_p2 = scmp.ne.s32.totalorder %s117_s6, %s195_s7  ;;  %p201_p4 = scmp.lt.s32.totalorder %s195_s7, %s195_s7 }
  0x2c   :  { %135 = vmatpush3.bf16.msra.mxu0 %v148_v3  ;;  %p202_p5 = por %p201_p4, %p200_p3 }
  0x2e   :  { %p203_p6 = pnand %p202_p5, %p196_p2 }
  0x31   :  { %v150_v4 = vpop.eup %149 }
  0x32   :  { %v45_v5 = vpack.c.bf16 %v150_v4, %v150_v4 }
  0x34   :  { %47 = vst.msk [vmem:[#allocation2] sm:$0xf] %vm46_vm1, %v45_v5 }
  0x3b   :  { %v48_v6 = vld [vmem:[#allocation2] sm:$0xf] }
  0x3c   :  { %137 = vmatmul.mubr.msk.bf16.vlgmr.msra.gmra.mrb[0].mxu0 %vm65_vm2, %v48_v6 }
 0x10f   :  { %v103_v7 = vpop.f32.mrb[0].mxu0 }
 0x110   :  { %109 = vst [vmem:[#allocation8] sm:$0xff] %v103_v7  ;;  %v138_v8 = vpop.f32.mrb[1].mxu0 }
 0x111   :  { %v106_v9 = vpop.f32.mrb[2].mxu0 }
 0x112   :  { %206 = shalt.err (!%p203_p6)
}
 0x113   :  { %s207_s10 = scalar_lea.hbm %s290_s2, 128 }
 0x114   :  { %p208_p7 = scmp.ne.s32.totalorder %s290_s2, %s207_s10  ;;  %p211_p8 = scmp.lt.u32.totalorder %s207_s10, %s290_s2 }
 0x116   :  { %p213_p9 = pnand %p211_p8, %p208_p7 }
 0x118   :  { %216 = shalt.err (!%p213_p9)
}
 0x119   :  { %119 = dma.vmem_to_hbm [thread:$0]  %s117_s6, 128, %s290_s2, [#allocation5]   ;;  %v139_v10 = vpop.f32.mrb[3].mxu0 }
 0x11a   :  { %221 = dma.done.wait [#allocation5], 128  }
 0x11b   :  { %222 = vsyncadd [#allocation5], 4294967168 }
 0x11c   :  { %123 = vsyncpa [#allocation4], 1 }
 0x11d   :  { %124 = vsyncpa [#allocation7], 1 }
 0x11e   :  { %125 = vsyncpa [#allocation5], 1 }

</bundles_post_ra>
